<compile_context>
chip_gen: v6e
topology: v6e:2x2x1
jax: 0.10.0
libtpu: 0.0.40
codegen_flags: <defaults>
</compile_context>

<pallas_src>
import jax
import jax.numpy as jnp
from jax import lax
from jax.experimental import pallas as pl
from jax.experimental.pallas import tpu as pltpu


def _make_focal_kernel(alpha, gamma, ignore_index, ts, tso, num_rows):
    a = float(alpha)
    g = float(gamma)
    ign = int(ignore_index)
    fold = ts // tso  # number of (tso,128) slabs folded into the accumulator

    def kernel(logits_ref, tgt_ref, out_ref):
        # logits_ref: (C, TS, 128)   native-dtype logits tile
        # tgt_ref   : (TS, 128)      int32 targets tile
        # out_ref   : (2, TSo, 128)  f32 per-image accumulator (resident):
        #             out_ref[0] = per-lane partial sum of focal loss
        #             out_ref[1] = per-lane partial count of valid elements
        i = pl.program_id(1)

        @pl.when(i == 0)
        def _():
            out_ref[...] = jnp.zeros_like(out_ref)

        x = logits_ref[...].astype(jnp.float32)            # (C, TS, 128)
        t = tgt_ref[...]                                    # (TS, 128)

        # Mask for the ragged tail of the position axis (partial last tile).
        row = lax.broadcasted_iota(jnp.int32, t.shape, 0) + i * ts
        valid = jnp.logical_and(t != ign, row < num_rows)   # (TS, 128) bool

        # Numerically stable softmax pieces over the class axis.  Axis 0 is a
        # batch of full (TS,128) vregs -> pure VPU/EUP work, no sublane XLU.
        m = jnp.max(x, axis=0)                              # (TS, 128)
        e = jnp.exp(x - m)                                  # (C, TS, 128)
        sum_e = jnp.sum(e, axis=0)                          # (TS, 128)

        # One-hot gather of the target class (C is tiny).
        # NOTE: targets outside [0, C) (other than ignore_index) yield x_t=0
        # instead of an error, unlike PyTorch cross_entropy.
        cls = lax.broadcasted_iota(jnp.int32, x.shape, 0)
        onehot = cls == t
        x_t = jnp.sum(jnp.where(onehot, x, 0.0), axis=0)    # target logit
        e_t = jnp.sum(jnp.where(onehot, e, 0.0), axis=0)    # exp(x_t - m)

        ce = jnp.log(sum_e) - (x_t - m)                     # cross entropy
        pt = e_t / sum_e                                    # == exp(-ce)
        one_minus_pt = 1.0 - pt
        if g.is_integer() and g >= 0:
            mod = jnp.ones_like(one_minus_pt)
            for _ in range(int(g)):                         # gamma == 2
                mod = mod * one_minus_pt
        else:
            mod = jnp.power(one_minus_pt, g)
        focal = a * mod * ce

        # where (not multiply): garbage/NaN in the unread tail must not
        # poison the sums.
        contrib = jnp.where(valid, focal, 0.0)              # (TS, 128)
        cnt = valid.astype(jnp.float32)

        def _fold(v):  # (TS,128) -> (TSo,128) via aligned static-slice adds
            acc = v[0:tso]
            for k in range(1, fold):
                acc = acc + v[k * tso:(k + 1) * tso]
            return acc

        out_ref[0] += _fold(contrib)
        out_ref[1] += _fold(cnt)

    return kernel


def focal_loss(inputs, targets, *, alpha=0.75, gamma=2, ignore_index=0,
               reduction="mean", tile_sublanes=512):
    """FocalLoss forward.

    inputs : (N, C, d1, d2, ...) float logits (kept in native dtype; cast to
             f32 happens inside the kernel after the DMA).
    targets: (N, d1, d2, ...)    integer class labels.
    Returns a scalar: mean focal loss over the non-ignored elements.
    Like the PyTorch module, the result is NaN if *every* element is ignored
    (mean over an empty set).
    """
    if reduction != "mean":
        # TODO(synk): reduction='none' returns a ragged (data-dependent size)
        # per-element loss vector, which has no clean static-shape Pallas form.
        raise NotImplementedError("only reduction='mean' is implemented")

    N, C = inputs.shape[0], inputs.shape[1]
    lanes = 128

    # Native layout, free reshapes only: (N, C, HW) / (N, HW).
    logits = inputs.reshape(N, C, -1)
    tgt = targets.reshape(N, -1).astype(jnp.int32)
    hw = logits.shape[2]

    # Lane-dense positions: HW -> (R, 128).  Pad only in the rare case the
    # spatial size is not a multiple of 128; padded targets = ignore_index.
    hwp = pl.cdiv(hw, lanes) * lanes
    if hwp != hw:
        # TODO(synk): this pad is an extra HBM copy; unavoidable without a
        # gather when H*W is not a multiple of the 128-lane width.
        logits = jnp.pad(logits, ((0, 0), (0, 0), (0, hwp - hw)))
        tgt = jnp.pad(tgt, ((0, 0), (0, hwp - hw)),
                      constant_values=ignore_index)
    num_rows = hwp // lanes
    logits = logits.reshape(N, C, num_rows, lanes)
    tgt = tgt.reshape(N, num_rows, lanes)

    # Position tile: TS sublanes x 128 lanes (TS*128 positions per step).
    # TS must be a multiple of 8, or cover the full row axis.
    if num_rows <= tile_sublanes:
        ts = num_rows
    else:
        ts = max((int(tile_sublanes) // 8) * 8, 8)
    tso = 8 if ts % 8 == 0 else ts            # accumulator sublane height
    n_tiles = pl.cdiv(num_rows, ts)

    kernel = _make_focal_kernel(alpha, gamma, ignore_index, ts, tso, num_rows)

    sums = pl.pallas_call(
        kernel,
        out_shape=jax.ShapeDtypeStruct((N, 2, tso, lanes), jnp.float32),
        grid_spec=pltpu.PrefetchScalarGridSpec(
            num_scalar_prefetch=0,
            grid=(N, n_tiles),
            in_specs=[
                # logits tile: (C, TS, 128) straight from the native layout
                pl.BlockSpec((None, C, ts, lanes), lambda n, i: (n, 0, i, 0)),
                # targets tile: (TS, 128)
                pl.BlockSpec((None, ts, lanes), lambda n, i: (n, i, 0)),
            ],
            # Per-image accumulator block, resident across the position axis.
            out_specs=pl.BlockSpec((None, 2, tso, lanes),
                                   lambda n, i: (n, 0, 0, 0)),
        ),
        compiler_params=pltpu.CompilerParams(
            dimension_semantics=("parallel", "arbitrary")),
    )(logits, tgt)

    loss_sum = jnp.sum(sums[:, 0])
    valid_cnt = jnp.sum(sums[:, 1])
    return loss_sum / valid_cnt


def ref_focal_loss(inputs, targets, alpha=0.75, gamma=2, ignore_index=0):
    """Pure-JAX reference matching the PyTorch FocalLoss forward."""
    C = inputs.shape[1]
    logits = jnp.moveaxis(inputs, 1, -1).reshape(-1, C).astype(jnp.float32)
    tgt = targets.reshape(-1).astype(jnp.int32)
    mask = tgt != ignore_index

    m = jnp.max(logits, axis=-1)
    lse = m + jnp.log(jnp.sum(jnp.exp(logits - m[:, None]), axis=-1))
    x_t = jnp.take_along_axis(logits, tgt[:, None], axis=-1)[:, 0]
    ce = lse - x_t
    pt = jnp.exp(-ce)
    loss = alpha * (1.0 - pt) ** gamma * ce
    loss = jnp.where(mask, loss, 0.0)
    return jnp.sum(loss) / jnp.sum(mask)


if __name__ == "__main__":
    N, C, H, W = 2, 4, 16, 16

    key = jax.random.PRNGKey(0)
    k_logits, k_tgt = jax.random.split(key)
    inputs = jax.random.normal(k_logits, (N, C, H, W), jnp.float32)
    targets = jax.random.randint(k_tgt, (N, H, W), 0, C, dtype=jnp.int32)

    out = jax.block_until_ready(focal_loss(inputs, targets))
    ref = jax.block_until_ready(ref_focal_loss(inputs, targets))

    assert out.shape == (), out.shape
    assert jnp.isfinite(out), float(out)
    assert jnp.allclose(out, ref, atol=1e-5, rtol=1e-5), (float(out), float(ref))

    print("KERNEL_OK")
</pallas_src>

<mosaic_0001>
module attributes {stable_mosaic.version = 11 : i64} {
  func.func @kernel(%arg0: i32, %arg1: i32, %arg2: memref<1x4x2x128xf32, #tpu.memory_space<vmem>>, %arg3: memref<1x2x128xi32, #tpu.memory_space<vmem>>, %arg4: memref<1x2x2x128xf32, #tpu.memory_space<vmem>>) attributes {dimension_semantics = [#tpu.dimension_semantics<parallel>, #tpu.dimension_semantics<arbitrary>], iteration_bounds = array<i64: 2, 1>, scalar_prefetch = 0 : i64, scratch_operands = 0 : i64, tpu.core_type = #tpu.core_type<tc>, window_params = [{transform_indices = @transform_0, window_bounds = array<i64: 1, 4, 2, 128>}, {transform_indices = @transform_1, window_bounds = array<i64: 1, 2, 128>}, {transform_indices = @transform_2, window_bounds = array<i64: 1, 2, 2, 128>}]} {
    %c0_i32 = arith.constant 0 : i32
    %0 = arith.cmpi eq, %arg1, %c0_i32 : i32
    %1 = arith.extui %0 : i1 to i32
    %c0_i32_0 = arith.constant 0 : i32
    %2 = arith.cmpi ne, %1, %c0_i32_0 : i32
    scf.if %2 {
      %cst_33 = arith.constant 0.000000e+00 : f32
      %60 = vector.broadcast %cst_33 : f32 to vector<2x2x128xf32>
      %c0_34 = arith.constant 0 : index
      %c0_35 = arith.constant 0 : index
      %c0_36 = arith.constant 0 : index
      %c0_37 = arith.constant 0 : index
      %61 = vector.load %arg4[%c0_34, %c0_35, %c0_36, %c0_37] : memref<1x2x2x128xf32, #tpu.memory_space<vmem>>, vector<1x2x2x128xf32>
      %62 = vector.shape_cast %61 : vector<1x2x2x128xf32> to vector<2x2x128xf32>
      %63 = vector.shape_cast %60 : vector<2x2x128xf32> to vector<1x2x2x128xf32>
      tpu.vector_store %arg4[%c0_34, %c0_35, %c0_36, %c0_37], %63 {strides = array<i32>} : memref<1x2x2x128xf32, #tpu.memory_space<vmem>>, vector<1x2x2x128xf32>,
    } else {
    }
    %c0 = arith.constant 0 : index
    %c0_1 = arith.constant 0 : index
    %c0_2 = arith.constant 0 : index
    %c0_3 = arith.constant 0 : index
    %3 = vector.load %arg2[%c0, %c0_1, %c0_2, %c0_3] : memref<1x4x2x128xf32, #tpu.memory_space<vmem>>, vector<1x4x2x128xf32>
    %4 = vector.shape_cast %3 : vector<1x4x2x128xf32> to vector<4x2x128xf32>
    %c0_4 = arith.constant 0 : index
    %c0_5 = arith.constant 0 : index
    %c0_6 = arith.constant 0 : index
    %5 = vector.load %arg3[%c0_4, %c0_5, %c0_6] : memref<1x2x128xi32, #tpu.memory_space<vmem>>, vector<1x2x128xi32>
    %6 = vector.shape_cast %5 : vector<1x2x128xi32> to vector<2x128xi32>
    %7 = tpu.iota {dimensions = array<i32: 0>} : vector<2x128xi32>
    %c2_i32 = arith.constant 2 : i32
    %8 = arith.muli %arg1, %c2_i32 : i32
    %9 = vector.broadcast %8 : i32 to vector<2x128xi32>
    %10 = arith.addi %7, %9 : vector<2x128xi32>
    %c0_i32_7 = arith.constant 0 : i32
    %11 = vector.broadcast %c0_i32_7 : i32 to vector<2x128xi32>
    %12 = arith.cmpi ne, %6, %11 : vector<2x128xi32>
    %c2_i32_8 = arith.constant 2 : i32
    %13 = vector.broadcast %c2_i32_8 : i32 to vector<2x128xi32>
    %14 = arith.cmpi slt, %10, %13 : vector<2x128xi32>
    %15 = arith.andi %12, %14 : vector<2x128xi1>
    %cst = arith.constant dense<0xFF800000> : vector<2x128xf32>
    %16 = vector.multi_reduction <maximumf>, %4, %cst [0] : vector<4x2x128xf32> to vector<2x128xf32>
    %17 = vector.shape_cast %16 : vector<2x128xf32> to vector<1x2x128xf32>
    %18 = vector.broadcast %17 : vector<1x2x128xf32> to vector<4x2x128xf32>
    %19 = arith.subf %4, %18 : vector<4x2x128xf32>
    %20 = math.exp %19 : vector<4x2x128xf32>
    %cst_9 = arith.constant dense<0.000000e+00> : vector<2x128xf32>
    %21 = vector.multi_reduction <add>, %20, %cst_9 [0] : vector<4x2x128xf32> to vector<2x128xf32>
    %22 = tpu.iota {dimensions = array<i32: 0>} : vector<4x2x128xi32>
    %23 = vector.shape_cast %6 : vector<2x128xi32> to vector<1x2x128xi32>
    %24 = vector.broadcast %23 : vector<1x2x128xi32> to vector<4x2x128xi32>
    %25 = arith.cmpi eq, %22, %24 : vector<4x2x128xi32>
    %cst_10 = arith.constant 0.000000e+00 : f32
    %26 = vector.broadcast %cst_10 : f32 to vector<4x2x128xf32>
    %27 = arith.select %25, %4, %26 : vector<4x2x128xi1>, vector<4x2x128xf32>
    %cst_11 = arith.constant dense<0.000000e+00> : vector<2x128xf32>
    %28 = vector.multi_reduction <add>, %27, %cst_11 [0] : vector<4x2x128xf32> to vector<2x128xf32>
    %cst_12 = arith.constant 0.000000e+00 : f32
    %29 = vector.broadcast %cst_12 : f32 to vector<4x2x128xf32>
    %30 = arith.select %25, %20, %29 : vector<4x2x128xi1>, vector<4x2x128xf32>
    %cst_13 = arith.constant dense<0.000000e+00> : vector<2x128xf32>
    %31 = vector.multi_reduction <add>, %30, %cst_13 [0] : vector<4x2x128xf32> to vector<2x128xf32>
    %32 = math.log %21 : vector<2x128xf32>
    %33 = arith.subf %28, %16 : vector<2x128xf32>
    %34 = arith.subf %32, %33 : vector<2x128xf32>
    %35 = arith.divf %31, %21 : vector<2x128xf32>
    %cst_14 = arith.constant 1.000000e+00 : f32
    %36 = vector.broadcast %cst_14 : f32 to vector<2x128xf32>
    %37 = arith.subf %36, %35 : vector<2x128xf32>
    %cst_15 = arith.constant 1.000000e+00 : f32
    %38 = vector.broadcast %cst_15 : f32 to vector<2x128xf32>
    %39 = arith.mulf %38, %37 : vector<2x128xf32>
    %40 = arith.mulf %39, %37 : vector<2x128xf32>
    %cst_16 = arith.constant 7.500000e-01 : f32
    %41 = vector.broadcast %cst_16 : f32 to vector<2x128xf32>
    %42 = arith.mulf %41, %40 : vector<2x128xf32>
    %43 = arith.mulf %42, %34 : vector<2x128xf32>
    %cst_17 = arith.constant 0.000000e+00 : f32
    %44 = vector.broadcast %cst_17 : f32 to vector<2x128xf32>
    %45 = arith.select %15, %43, %44 : vector<2x128xi1>, vector<2x128xf32>
    %46 = arith.extui %15 : vector<2x128xi1> to vector<2x128xi32>
    %47 = arith.sitofp %46 : vector<2x128xi32> to vector<2x128xf32>
    %c0_18 = arith.constant 0 : index
    %c0_19 = arith.constant 0 : index
    %c0_20 = arith.constant 0 : index
    %c0_21 = arith.constant 0 : index
    %48 = vector.load %arg4[%c0_18, %c0_19, %c0_20, %c0_21] : memref<1x2x2x128xf32, #tpu.memory_space<vmem>>, vector<1x1x2x128xf32>
    %49 = vector.shape_cast %48 : vector<1x1x2x128xf32> to vector<2x128xf32>
    %50 = arith.addf %49, %45 : vector<2x128xf32>
    %c0_22 = arith.constant 0 : index
    %c0_23 = arith.constant 0 : index
    %c0_24 = arith.constant 0 : index
    %c0_25 = arith.constant 0 : index
    %51 = vector.load %arg4[%c0_22, %c0_23, %c0_24, %c0_25] : memref<1x2x2x128xf32, #tpu.memory_space<vmem>>, vector<1x1x2x128xf32>
    %52 = vector.shape_cast %51 : vector<1x1x2x128xf32> to vector<2x128xf32>
    %53 = vector.shape_cast %50 : vector<2x128xf32> to vector<1x1x2x128xf32>
    tpu.vector_store %arg4[%c0_22, %c0_23, %c0_24, %c0_25], %53 {strides = array<i32>} : memref<1x2x2x128xf32, #tpu.memory_space<vmem>>, vector<1x1x2x128xf32>,
    %c0_26 = arith.constant 0 : index
    %c1 = arith.constant 1 : index
    %c0_27 = arith.constant 0 : index
    %c0_28 = arith.constant 0 : index
    %54 = vector.load %arg4[%c0_26, %c1, %c0_27, %c0_28] : memref<1x2x2x128xf32, #tpu.memory_space<vmem>>, vector<1x1x2x128xf32>
    %55 = vector.shape_cast %54 : vector<1x1x2x128xf32> to vector<2x128xf32>
    %56 = arith.addf %55, %47 : vector<2x128xf32>
    %c0_29 = arith.constant 0 : index
    %c1_30 = arith.constant 1 : index
    %c0_31 = arith.constant 0 : index
    %c0_32 = arith.constant 0 : index
    %57 = vector.load %arg4[%c0_29, %c1_30, %c0_31, %c0_32] : memref<1x2x2x128xf32, #tpu.memory_space<vmem>>, vector<1x1x2x128xf32>
    %58 = vector.shape_cast %57 : vector<1x1x2x128xf32> to vector<2x128xf32>
    %59 = vector.shape_cast %56 : vector<2x128xf32> to vector<1x1x2x128xf32>
    tpu.vector_store %arg4[%c0_29, %c1_30, %c0_31, %c0_32], %59 {strides = array<i32>} : memref<1x2x2x128xf32, #tpu.memory_space<vmem>>, vector<1x1x2x128xf32>,
    return
  }
  func.func @transform_0(%arg0: i32, %arg1: i32) -> (i32, i32, i32, i32) {
    %c0_i32 = arith.constant 0 : i32
    %c0_i32_0 = arith.constant 0 : i32
    %c0_i32_1 = arith.constant 0 : i32
    return %arg0, %c0_i32, %arg1, %c0_i32_0 : i32, i32, i32, i32
  }
  func.func @transform_1(%arg0: i32, %arg1: i32) -> (i32, i32, i32) {
    %c0_i32 = arith.constant 0 : i32
    %c0_i32_0 = arith.constant 0 : i32
    return %arg0, %arg1, %c0_i32 : i32, i32, i32
  }
  func.func @transform_2(%arg0: i32, %arg1: i32) -> (i32, i32, i32, i32) {
    %c0_i32 = arith.constant 0 : i32
    %c0_i32_0 = arith.constant 0 : i32
    %c0_i32_1 = arith.constant 0 : i32
    %c0_i32_2 = arith.constant 0 : i32
    return %arg0, %c0_i32, %c0_i32_0, %c0_i32_1 : i32, i32, i32, i32
  }
}

</mosaic_0001>

<bundles_post_ra>
// kernel: tpu_custom_call.1
= control target key start
LH: loop header
LB: loop body
LE: loop exit
PB: predicated region body
PF: predicated region fallthrough
CT: control target
= control target key end

     0   :  { %7 = vsyncpa [#allocation3], 0  ;;  %s919_s0 = inlined_call_operand.hbm [shape: f32[2,4,2,128], index: 0, kind: input, shape index: {}]   ;;  %s920_s1 = inlined_call_operand.hbm [shape: s32[2,2,128], index: 1, kind: input, shape index: {}]   ;;  %s921_s2 = inlined_call_operand.hbm [shape: f32[2,2,2,128], index: 2, kind: output, shape index: {}]  }
   0x1   :  { %9 = vsyncpa [#allocation3 + $0x1], 0 }
   0x2   :  { %10 = vsyncpa [#allocation6], 0 }
   0x3   :  { %12 = vsyncpa [#allocation6 + $0x1], 0 }
   0x4   :  { %13 = vsyncpa [#allocation4], 0 }
   0x5   :  { %15 = vsyncpa [#allocation4 + $0x1], 0  ;;  %s702_s9 = smov 0   ;;  %s704_s10 = smov 0  }
   0x6   :  { %s706_s11 = smov 0   ;;  %s708_s12 = smov 0  }
   0x7   :  { %s710_s13 = smov 0   ;;  %s712_s14 = smov 0  }
   0x8 LB: > { %s430_s15 = sadd.s32 4294967295, %s677_s14   ;;  %s431_s16 = sadd.s32 4294967294, %s677_s14   ;;  %s677_s14 = sphi %s712_s14, %s21_s14   ;;  %s673_s13 = sphi %s710_s13, %s934_s13   ;;  %s669_s12 = sphi %s708_s12, %s933_s12   ;;  %s665_s11 = sphi %s706_s11, %s932_s11   ;;  %s661_s10 = sphi %s704_s10, %s931_s10   ;;  %s657_s9 = sphi %s702_s9, %s930_s9  }
   0x9   : > { %s33_s17 = sadd.s32 1, %s673_s13  ;;  %s42_s18 = sadd.s32 1, %s665_s11 }
   0xa   : > { %p35_p0 = scmp.ge.s32.totalorder %s33_s17, 2  ;;  %p49_p1 = scmp.ne.s32.totalorder %s665_s11, %s661_s10 }
   0xb   : > { %p50_p2 = scmp.eq.s32.totalorder %s677_s14, 0  ;;  %p55_p3 = scmp.ne.s32.totalorder %s661_s10, %s657_s9 }
   0xc   : > { %s936_s17 = smov (%p35_p0, %s33_s17), 0  ;;  %p56_p5 = scmp.eq.s32.totalorder %s430_s15, 0 }
   0xd   : > { %p743_p4 = por %p50_p2, %p49_p1  ;;  %s37_s20 = ssub.s32 %s673_s13, %s936_s17 }
   0xe   : > { %p107_p6 = scmp.eq.s32.totalorder %s430_s15, 1  ;;  %p40_p7 = scmp.eq.s32.totalorder %s37_s20, 0 }
   0xf   : > { %p749_p8 = por %p56_p5, %p55_p3  ;;  %p113_p10 = scmp.eq.s32.totalorder %s431_s16, 1 }
  0x10   : > { %p753_p9 = por %p107_p6, %p49_p1  ;;  %p433_p12 = scmp.ge.s32.totalorder %s677_s14, 2 }
  0x11   : > { %s758_s23 = scalar_select %p40_p7, %s665_s11, %s42_s18  }
  0x12   : > { %p760_p11 = por %p113_p10, %p55_p3  ;;  %p470_p13 = scmp.lt.s32.totalorder %s677_s14, 2 }
  0x13   : > { %s767_s25 = sand.u32 1, %s665_s11   ;;  %s451_s27 = sshll.u32 %s673_s13, 7 }
  0x14   : > { %s434_s26 = sshll.u32 %s767_s25, 3  ;;  %s144_s30 = scalar_lea.hbm %s919_s0, %s451_s27 }
  0x15   : > { %s137_s3 = scalar_lea.vmem [#allocation2], %s434_s26  ;;  %p776_p0 = pnand %p470_p13, %p743_p4 }
  0x16   : > { %s145_s4 = sshll.u32 %s137_s3, 4  ;;  %p439_p1 = scmp.ge.s32.totalorder %s677_s14, 1  ;;  %s146_s4 = int_to_ptr.vmem [resolvable:$true] %s145_s4 }
  0x17   : > { %s134_s6 = scalar_lea.sflag [#allocation3], %s767_s25  ;;  %p539_p2 = pneg %p776_p0 }
  0x18   : > { %s550_s7 = scalar_lea.vmem %s146_s4, 128  ;;  %s679_s8 = smov [#allocation2]  }
  0x19   : > { %p551_p3 = scmp.ne.s32.totalorder %s146_s4, %s550_s7  ;;  %s555_s15 = sshll.u32 %s679_s8, 4  ;;  %s556_s15 = int_to_ptr.vmem [resolvable:$false] %s555_s15 }
  0x1a   : > { %s557_s16 = scalar_lea.vmem %s556_s15, 256  ;;  %p558_p4 = scmp.lt.s32.totalorder %s146_s4, %s556_s15 }
  0x1b   : > { %p553_p5 = pnand %p551_p3, %p539_p2  ;;  %p559_p7 = scmp.lt.s32.totalorder %s557_s16, %s550_s7 }
  0x1d   : > { %p554_p6 = pneg %p553_p5  ;;  %p560_p10 = por %p559_p7, %p558_p4 }
  0x1f   : > { %p561_p13 = pnand %p560_p10, %p554_p6 }
  0x21   : > { %564 = shalt.err (!%p561_p13)
}
  0x22   : > { %s680_s18 = smov 32   ;;  %s681_s19 = smov 2  }
  0x23   : > { %462 = dma.hbm_to_vmem [thread:$0]  (!%p776_p0), %s144_s30, 128, %s146_s4, %s134_s6, %s680_s18, %s680_s18, %s681_s19  }
  0x24   : > { %p172_p3 = scmp.lt.s32.totalorder %s677_s14, 3  ;;  %s437_s20 = sshll.u32 %s767_s25, 1 }
  0x25   : > { %s438_s26 = sshll.u32 %s673_s13, 5  ;;  %s159_s7 = scalar_lea.vmem [#allocation5], %s437_s20 }
  0x26   : > { %p794_p5 = pnand %p439_p1, %p172_p3  ;;  %s165_s3 = scalar_lea.hbm %s920_s1, %s438_s26 }
  0x27   : > { %s167_s8 = sshll.u32 %s159_s7, 4  ;;  %s156_s15 = scalar_lea.sflag [#allocation6], %s767_s25  ;;  %s168_s8 = int_to_ptr.vmem [resolvable:$true] %s167_s8 }
  0x28   : > { %s578_s16 = scalar_lea.vmem %s168_s8, 32  ;;  %s682_s30 = smov [#allocation5]  }
  0x29   : > { %p579_p6 = scmp.ne.s32.totalorder %s168_s8, %s578_s16  ;;  %s583_s4 = sshll.u32 %s682_s30, 4  ;;  %s584_s4 = int_to_ptr.vmem [resolvable:$false] %s583_s4 }
  0x2a   : > { %s585_s6 = scalar_lea.vmem %s584_s4, 64  ;;  %p586_p1 = scmp.lt.s32.totalorder %s168_s8, %s584_s4 }
  0x2b   : > { %p581_p4 = pnand %p579_p6, %p539_p2  ;;  %p587_p10 = scmp.lt.s32.totalorder %s585_s6, %s578_s16 }
  0x2d   : > { %p582_p7 = pneg %p581_p4  ;;  %p588_p13 = por %p587_p10, %p586_p1 }
  0x2f   : > { %p589_p3 = pnand %p588_p13, %p582_p7 }
  0x31   : > { %592 = shalt.err (!%p589_p3)
}
  0x32   : > { %465 = dma.hbm_to_vmem [thread:$0]  (!%p776_p0), %s165_s3, 32, %s168_s8, %s156_s15  }
  0x33   : > { %176 = sbr.rel (%p794_p5) target bundleno = 136 (0x88), region = 28  ;;  %s810_s25 = sand.u32 (!%p794_p5), 1, %s661_s10  }
  0x34   : > { %s440_s18 = sshll.u32 (!%p794_p5), %s810_s25, 3  ;;  %s179_s19 = scalar_lea.sflag (!%p794_p5), [#allocation3], %s810_s25 }
  0x35   : > { %s182_s20 = scalar_lea.vmem (!%p794_p5), [#allocation2], %s440_s18 }
  0x38   : > { %644 = dma.done.wait (%p749_p8), %s179_s19, 128  }
  0x39   : > { %646 = vsyncadd (%p749_p8), %s179_s19, 4294967168  ;;  %s441_s5 = sshll.u32 %s810_s25, 1  ;;  %s188_s26 = scalar_lea.sflag [#allocation6], %s810_s25 }
  0x3a   : > { %s191_s27 = scalar_lea.vmem [#allocation5], %s441_s5 }
  0x3b   : > { %648 = dma.done.wait (%p749_p8), %s188_s26, 32  }
  0x3c   : > { %650 = vsyncadd (%p749_p8), %s188_s26, 4294967264  ;;  %s442_s28 = sshll.u32 %s810_s25, 2  ;;  %v228_v0 = vlaneseq  ;;  %v683_v1 = vmov 0.0   ;;  %vm236_vm0 = vcmask 1041408   ;;  %v223_v3 = vld [vmem:[%s182_s20] sm:$0x3] }
  0x3d   : > { %s825_s29 = scalar_lea.vmem [#allocation7], %s442_s28  ;;  %v224_v4 = vld [vmem:[%s182_s20 + $0x2] sm:$0x3]  ;;  %v225_v5 = vld [vmem:[%s182_s20 + $0x4] sm:$0x3]  ;;  %v237_v8 = vsel %vm236_vm0, %v223_v3, -inf }
  0x3e   : > { %221 = vst [vmem:[%s825_s29] sm:$0x3] %v683_v1  ;;  %v229_v2 = vshrl.u32 %v228_v0, 7  ;;  %222 = vst [vmem:[%s825_s29 + $0x2] sm:$0x3] %v683_v1  ;;  %v226_v6 = vld [vmem:[%s182_s20 + $0x6] sm:$0x3] }
  0x3f   : > { %v227_v7 = vld [vmem:[%s191_s27] sm:$0x3]  ;;  %v238_v9 = vsel %vm236_vm0, %v224_v4, -inf  ;;  %v239_v10 = vsel %vm236_vm0, %v225_v5, -inf  ;;  %v240_v11 = vsel %vm236_vm0, %v226_v6, -inf  ;;  %s452_s21 = sshll.u32 %s669_s12, 6 }
  0x40   : > { %vm234_vm1 = vcmp.lt.s32.totalorder %v229_v2, 2  ;;  %vm233_vm2 = vcmp.ne.s32.totalorder %v227_v7, 0  ;;  %v241_v12 = vmax.f32 %v237_v8, %v238_v9  ;;  %v242_v14 = vmax.f32 %v239_v10, %v240_v11  ;;  %s323_s3 = sshll.u32 %s825_s29, 4  ;;  %s868_s15 = scalar_lea.hbm %s921_s2, %s452_s21  ;;  %s870_s3 = int_to_ptr.vmem [resolvable:$true] %s323_s3 }
  0x41   : > { %vm833_vm3 = vmand %vm233_vm2, %vm234_vm1  ;;  %vm263_vm4 = vcmp.eq.s32.totalorder %v227_v7, 0  ;;  %vm264_vm5 = vcmp.eq.s32.totalorder %v227_v7, 1  ;;  %vm265_vm6 = vcmp.eq.s32.totalorder %v227_v7, 2  ;;  %vm266_vm7 = vcmp.eq.s32.totalorder %v227_v7, 3  ;;  %s310_s16 = scalar_lea.sflag [#allocation4], %s810_s25  ;;  %s593_s12 = scalar_lea.vmem %s870_s3, 64 }
  0x42   : > { %v837_v15 = vmax.f32 %v241_v12, %v242_v14  ;;  %v443_v17 = vsel %vm833_vm3, 1.0, %v683_v1  ;;  %v267_v37 = vsel %vm263_vm4, %v223_v3, 0.0  ;;  %v268_v38 = vsel %vm264_vm5, %v224_v4, 0.0  ;;  %p594_p8 = scmp.ne.s32.totalorder %s870_s3, %s593_s12  ;;  %s684_s30 = smov [#allocation7]  }
  0x43   : > { %v271_v42 = vsel %vm236_vm0, %v267_v37, 0.0  ;;  %v272_v43 = vsel %vm236_vm0, %v268_v38, 0.0  ;;  %v269_v46 = vsel %vm265_vm6, %v225_v5, 0.0  ;;  %v270_v52 = vsel %vm266_vm7, %v226_v6, 0.0  ;;  %s597_s4 = sshll.u32 %s684_s30, 4  ;;  %s598_s4 = int_to_ptr.vmem [resolvable:$false] %s597_s4 }
  0x44   : > { %v244_v18 = vsub.f32 %v223_v3, %v837_v15  ;;  %v245_v19 = vsub.f32 %v224_v4, %v837_v15  ;;  %v246_v20 = vsub.f32 %v225_v5, %v837_v15  ;;  %v247_v21 = vsub.f32 %v226_v6, %v837_v15  ;;  %p595_p0 = pnand %p594_p8, %p753_p9  ;;  %s599_s6 = scalar_lea.vmem %s598_s4, 128 }
  0x45   : > { %v444_v16 = vld [vmem:[%s825_s29 + $0x2] sm:$0x3]  ;;  %v273_v48 = vadd.f32 %v272_v43, %v271_v42  ;;  %v274_v50 = vsel %vm236_vm0, %v269_v46, 0.0  ;;  %v276_v56 = vsel %vm236_vm0, %v270_v52, 0.0  ;;  %v302_v6 = vld [vmem:[%s825_s29] sm:$0x3]  ;;  %p600_p5 = scmp.lt.s32.totalorder %s870_s3, %s598_s4  ;;  %p601_p6 = scmp.lt.s32.totalorder %s599_s6, %s593_s12 }
  0x46   : > { %v307_v22 = vadd.f32 %v444_v16, %v443_v17  ;;  %v248_v23 = vmul.f32 1.442695, %v244_v18  ;;  %v250_v24 = vmul.f32 1.442695, %v245_v19  ;;  %v252_v25 = vmul.f32 1.442695, %v246_v20  ;;  %p596_p2 = pneg %p595_p0 }
  0x47   : > { %v254_v26 = vmul.f32 1.442695, %v247_v21  ;;  %v275_v54 = vadd.f32 %v274_v50, %v273_v48  ;;  %p602_p4 = por %p601_p6, %p600_p5 }
  0x48   : > { %445 = vst [vmem:[%s825_s29 + $0x2] sm:$0x3] %v307_v22  ;;  %525 = vpow2.f32 %v248_v23 }
  0x49   : > { %527 = vpow2.f32 %v250_v24  ;;  %v277_v58 = vadd.f32 %v276_v56, %v275_v54  ;;  %p603_p7 = pnand %p602_p4, %p596_p2 }
  0x4a   : > { %529 = vpow2.f32 %v252_v25 }
  0x4b   : > { %531 = vpow2.f32 %v254_v26  ;;  %v291_v63 = vsub.f32 %v277_v58, %v837_v15 }
  0x55   : > { %v526_v27 = vpop.eup %525 }
  0x56   : > { %v528_v28 = vpop.eup %527  ;;  %v256_v29 = vsel %vm236_vm0, %v526_v27, 0.0  ;;  %v278_v39 = vsel %vm263_vm4, %v526_v27, 0.0 }
  0x57   : > { %v530_v30 = vpop.eup %529  ;;  %v257_v31 = vsel %vm236_vm0, %v528_v28, 0.0  ;;  %v279_v40 = vsel %vm264_vm5, %v528_v28, 0.0  ;;  %v282_v44 = vsel %vm236_vm0, %v278_v39, 0.0 }
  0x58   : > { %v532_v32 = vpop.eup %531  ;;  %v258_v33 = vadd.f32 %v257_v31, %v256_v29  ;;  %v259_v34 = vsel %vm236_vm0, %v530_v30, 0.0  ;;  %v283_v45 = vsel %vm236_vm0, %v279_v40, 0.0  ;;  %v280_v47 = vsel %vm265_vm6, %v530_v30, 0.0 }
  0x59   : > { %v261_v35 = vsel %vm236_vm0, %v532_v32, 0.0  ;;  %v284_v49 = vadd.f32 %v283_v45, %v282_v44  ;;  %v285_v51 = vsel %vm236_vm0, %v280_v47, 0.0  ;;  %v281_v53 = vsel %vm266_vm7, %v532_v32, 0.0 }
  0x5a   : > { %v260_v36 = vadd.f32 %v259_v34, %v258_v33  ;;  %v287_v57 = vsel %vm236_vm0, %v281_v53, 0.0 }
  0x5b   : > { %v286_v55 = vadd.f32 %v285_v51, %v284_v49 }
  0x5c   : > { %v262_v41 = vadd.f32 %v261_v35, %v260_v36 }
  0x5d   : > { %v288_v59 = vadd.f32 %v287_v57, %v286_v55 }
  0x5e   : > { %533 = vlog2.f32 %v262_v41 }
  0x5f   : > { %535 = vrcp.f32 %v262_v41 }
  0x6b   : > { %v534_v60 = vpop.eup %533 }
  0x6c   : > { %v536_v61 = vpop.eup %535  ;;  %v290_v62 = vmul.f32 0.6931472, %v534_v60 }
  0x6d   : > { %v294_v0 = vmul.f32 %v536_v61, %v288_v59 }
  0x6e   : > { %v292_v2 = vsub.f32 %v290_v62, %v291_v63 }
  0x6f   : > { %v295_v1 = vsub.f32 1.0, %v294_v0 }
  0x71   : > { %v296_v3 = vmul.f32 %v295_v1, %v295_v1 }
  0x73   : > { %v297_v4 = vmul.f32 0.75, %v296_v3 }
  0x75   : > { %v298_v5 = vmul.f32 %v297_v4, %v292_v2 }
  0x77   : > { %v299_v7 = vsel %vm833_vm3, %v298_v5, 0.0 }
  0x78   : > { %v303_v8 = vadd.f32 %v302_v6, %v299_v7 }
  0x7a   : > { %304 = vst [vmem:[%s825_s29] sm:$0x3] %v303_v8 }
  0x7b   : > { %606 = shalt.err (!%p603_p7)
}
  0x7c   : > { %s607_s18 = scalar_lea.hbm %s868_s15, 64  ;;  %s611_s5 = scalar_lea.hbm %s921_s2, 128 }
  0x7d   : > { %p608_p1 = scmp.ne.s32.totalorder %s868_s15, %s607_s18  ;;  %p612_p3 = scmp.lt.s32.totalorder %s868_s15, %s921_s2 }
  0x7e   : > { %p613_p8 = scmp.lt.s32.totalorder %s611_s5, %s607_s18 }
  0x7f   : > { %p609_p10 = pnand %p608_p1, %p753_p9 }
  0x80   : > { %p614_p0 = por %p613_p8, %p612_p3 }
  0x81   : > { %p610_p13 = pneg %p609_p10 }
  0x83   : > { %p615_p2 = pnand %p614_p0, %p610_p13 }
  0x85   : > { %618 = shalt.err (!%p615_p2)
}
  0x86   : > { %s685_s28 = smov 32   ;;  %s686_s29 = smov 2  }
  0x87   : > { %457 = dma.vmem_to_hbm [thread:$0]  (%p753_p9), %s870_s3, 64, %s868_s15, %s310_s16, %s685_s28, %s685_s28, %s686_s29  }
  0x88 PF: > { %s338_s21 = sand.u32 1, %s657_s9   ;;  %p467_p5 = pnand %p433_p12, %p760_p11 }
  0x89   : > { %s339_s7 = scalar_lea.sflag [#allocation4], %s338_s21 }
  0x8a   : > { %p468_p6 = pneg %p467_p5 }
  0x8c   : > { %652 = dma.done.wait (%p468_p6), %s339_s7, 64  }
  0x8d   : > { %654 = vsyncadd (%p468_p6), %s339_s7, 4294967232  ;;  %s21_s14 = sadd.s32 1, %s677_s14   ;;  %s930_s9 = smov %s661_s10 }
  0x8e   : > { %p18_p4 = scmp.ge.s32.totalorder %s21_s14, 4   ;;  %s931_s10 = smov %s665_s11 }
  0x8f   : > { %s932_s11 = smov %s758_s23  ;;  %s933_s12 = smov %s673_s13 }
  0x90   : > { %s934_s13 = smov %s936_s17  ;;  %20 = sbr.rel (!%p18_p4) target bundleno = 8 (0x8), region = 91 }
  0x95   :  { %344 = vsyncpa [#allocation3], 1 }
  0x96   :  { %346 = vsyncpa [#allocation3 + $0x1], 1 }
  0x97   :  { %347 = vsyncpa [#allocation6], 1 }
  0x98   :  { %349 = vsyncpa [#allocation6 + $0x1], 1 }
  0x99   :  { %350 = vsyncpa [#allocation4], 1 }
  0x9a   :  { %352 = vsyncpa [#allocation4 + $0x1], 1 }

</bundles_post_ra>
